<compile_context>
chip_gen: v5e
topology: v5e:2x2
jax: 0.10.0
libtpu: 0.0.40
codegen_flags: <defaults>
</compile_context>

<pallas_src>
import functools

import jax
import jax.numpy as jnp
import numpy as np
from jax import lax
from jax.experimental import pallas as pl
from jax.experimental.pallas import tpu as pltpu


def _round_up(x: int, m: int) -> int:
    return (x + m - 1) // m * m


def _pick_chunk(grid_size: int) -> int:
    """Points per sub-chunk, sized so the (chunk, G^2) one-hot temporaries (the int32 iota
    being the largest) stay within a fixed VMEM budget across generations."""
    budget = 8 * 1024 * 1024
    c = budget // (4 * grid_size * grid_size)
    c = max(128, min(2048, c))
    return (c // 128) * 128


def _voxelize_kernel(mn_ref, inv_ref, pts_ref, out_ref, *,
                     grid_size, sub_ranges, block_n, n_valid):
    """mn_ref/inv_ref: (1,1,3) f32; pts_ref: (1, block_n, 3) f32; out_ref: (1, G, G^2) f32."""
    G = grid_size
    G2 = G * G
    c = pl.program_id(1)

    @pl.when(c == 0)
    def _init():
        out_ref[...] = jnp.zeros(out_ref.shape, jnp.float32)

    mn = mn_ref[0]                       # (1, 3)
    inv = inv_ref[0]                     # (1, 3)
    base = c * block_n                   # global index of the first point in this block

    # Iotas shared across equal-sized sub-chunks (traced once -> single materialization).
    iota_cache = {}

    def iotas(size):
        if size not in iota_cache:
            iota_cache[size] = (
                lax.broadcasted_iota(jnp.int32, (size, 1), 0),    # point row index
                lax.broadcasted_iota(jnp.int32, (size, G), 1),    # x-bin index
                lax.broadcasted_iota(jnp.int32, (size, G2), 1),   # flattened yz-bin index
            )
        return iota_cache[size]

    for off, size in sub_ranges:
        p = pts_ref[0, off:off + size, :]                          # (size, 3) f32
        # Same arithmetic order as the reference: normalize to [-1, 1], then bin into
        # G equal bins over [-1, 1] (right edge folded into the last bin via the clip).
        norm = (p - mn) * inv * 2.0 - 1.0
        binf = jnp.floor((norm + 1.0) * (G * 0.5))
        bins = jnp.clip(binf, 0.0, float(G - 1)).astype(jnp.int32)  # (size, 3)
        ix = bins[:, 0:1]                                          # (size, 1)
        iyz = bins[:, 1:2] * G + bins[:, 2:3]                      # (size, 1)

        row, bx, byz = iotas(size)
        valid = (base + off + row) < n_valid                       # mask stale / padded rows

        # TODO(synk): use int8 one-hots (int MXU) on v5e/v6e and fp8 on v7x; bf16 is the
        # safe cross-generation fallback (0/1 exact in bf16, f32 accumulation -> exact counts).
        oh_x = ((bx == ix) & valid).astype(jnp.bfloat16)           # (size, G)
        oh_yz = (byz == iyz).astype(jnp.bfloat16)                  # (size, G2)

        # Contract over the point (sublane) axis of both one-hots -> (G, G^2) f32.
        contrib = lax.dot_general(
            oh_x, oh_yz, (((0,), (0,)), ((), ())),
            preferred_element_type=jnp.float32)
        out_ref[0, :, :] = out_ref[0, :, :] + contrib


def voxelize(points: jax.Array, grid_size: int = 64, *,
             chunk: int | None = None, inner: int = 2) -> jax.Array:
    """points: [B, N, 3] float32 -> voxel features [B, 1, G, G, G] float32."""
    B, N, C = points.shape
    assert C == 3
    G = grid_size
    points = points.astype(jnp.float32)

    # Per-batch normalization parameters: one cheap XLA reduce over the raw points.
    mn = jnp.min(points, axis=1, keepdims=True)                    # (B, 1, 3)
    mx = jnp.max(points, axis=1, keepdims=True)                    # (B, 1, 3)
    inv = 1.0 / (mx - mn + jnp.float32(1e-6))                      # (B, 1, 3)

    if chunk is None:
        chunk = _pick_chunk(G)
    chunk = max(8, _round_up(int(chunk), 8))
    inner = max(1, int(inner))

    block_n = inner * chunk
    pts_in = points
    if block_n >= N:
        # Single block per batch covering all points. Keep the MXU contraction (sublane)
        # size a multiple of 8 so no physical layout padding enters the contraction.
        n_pad = _round_up(N, 8)
        if n_pad != N:
            pts_in = jnp.pad(points, ((0, 0), (0, n_pad - N), (0, 0)))
        block_n = n_pad
        sub_ranges = tuple((o, min(chunk, n_pad - o)) for o in range(0, n_pad, chunk))
    else:
        sub_ranges = tuple((i * chunk, chunk) for i in range(inner))

    num_blocks = pl.cdiv(pts_in.shape[1], block_n)

    # Generation-aware VMEM ceiling (v7x: 64 MiB/TC; v5e/v6e: 128 MiB).
    try:
        vmem_cap = int(pltpu.get_tpu_info().vmem_capacity_bytes)
    except Exception:
        vmem_cap = 64 * 1024 * 1024
    vmem_limit = min(int(vmem_cap * 0.85), 100 * 1024 * 1024)

    kernel = functools.partial(
        _voxelize_kernel, grid_size=G, sub_ranges=sub_ranges,
        block_n=block_n, n_valid=N)

    hist = pl.pallas_call(
        kernel,
        out_shape=jax.ShapeDtypeStruct((B, G, G * G), jnp.float32),
        grid=(B, num_blocks),
        in_specs=[
            pl.BlockSpec((1, 1, 3), lambda b, c: (b, 0, 0)),            # per-batch min
            pl.BlockSpec((1, 1, 3), lambda b, c: (b, 0, 0)),            # per-batch 1/(max-min+eps)
            pl.BlockSpec((1, block_n, 3), lambda b, c: (b, c, 0)),      # point block
        ],
        out_specs=pl.BlockSpec((1, G, G * G), lambda b, c: (b, 0, 0)),
        compiler_params=pltpu.CompilerParams(
            dimension_semantics=("parallel", "arbitrary"),   # batches shard across TCs
            vmem_limit_bytes=vmem_limit,
        ),
    )(mn, inv, pts_in)

    # (B, G, G^2) row-major == (B, G, G, G) with [x, y, z] ordering -> add channel dim.
    # TODO(synk): for B == 1 on v7x (2 TCs), also split the point axis across cores into
    # partial histograms reduced by a trailing add so one core is not idle.
    return hist.reshape(B, G, G, G)[:, None]


if __name__ == "__main__":
    key = jax.random.PRNGKey(0)
    B, N = 2, 200            # N not a multiple of the block -> exercises partial blocks/masking
    grid_size = 16           # small stand-in for the module's default 64

    points = jax.random.uniform(
        key, (B, N, 3), dtype=jnp.float32, minval=-3.0, maxval=5.0)

    # Reference (numpy) with the same semantics as the PyTorch module.
    p = np.asarray(points)
    mn = p.min(axis=1, keepdims=True)
    mx = p.max(axis=1, keepdims=True)
    npts = (p - mn) / (mx - mn + np.float32(1e-6)) * 2 - 1
    ref = np.zeros((B, 1, grid_size, grid_size, grid_size), np.float32)
    for b in range(B):
        hist, _ = np.histogramdd(npts[b], bins=grid_size, range=[(-1.0, 1.0)] * 3)
        ref[b, 0] = hist.astype(np.float32)

    def check(vox, tag):
        vox_np = np.asarray(vox)
        assert vox.shape == (B, 1, grid_size, grid_size, grid_size), vox.shape
        assert vox.dtype == jnp.float32
        # Every real point lands in exactly one bin (invalid rows are masked out).
        np.testing.assert_allclose(
            vox_np.sum(axis=(1, 2, 3, 4)), np.full((B,), float(N)), err_msg=tag)
        # Bit-exact except for points whose normalized coordinate sits within a couple of
        # f32 ULPs of a bin edge; tolerate at most a few one-bin transfers.
        l1 = float(np.abs(vox_np - ref).sum())
        assert l1 <= 4.0, f"{tag}: voxel histogram mismatch, L1={l1}"

    # Multi-block path: chunk=64 -> block_n=128 -> 2 grid steps along N, with a partial,
    # masked trailing block and cross-step accumulation into the resident output block.
    vox_a = voxelize(points, grid_size=grid_size, chunk=64, inner=2)
    jax.block_until_ready(vox_a)
    check(vox_a, "multi-block")

    # Default auto-sized chunk path: whole batch handled by a single grid step.
    vox_b = voxelize(points, grid_size=grid_size)
    jax.block_until_ready(vox_b)
    check(vox_b, "single-block")

    print("KERNEL_OK")
</pallas_src>

<mosaic_0001>
module attributes {stable_mosaic.version = 11 : i64} {
  func.func @_voxelize_kernel(%arg0: i32, %arg1: i32, %arg2: memref<1x1x3xf32, #tpu.memory_space<vmem>>, %arg3: memref<1x1x3xf32, #tpu.memory_space<vmem>>, %arg4: memref<1x128x3xf32, #tpu.memory_space<vmem>>, %arg5: memref<1x16x256xf32, #tpu.memory_space<vmem>>) attributes {dimension_semantics = [#tpu.dimension_semantics<parallel>, #tpu.dimension_semantics<arbitrary>], iteration_bounds = array<i64: 2, 2>, scalar_prefetch = 0 : i64, scratch_operands = 0 : i64, tpu.core_type = #tpu.core_type<tc>, window_params = [{transform_indices = @transform_0, window_bounds = array<i64: 1, 1, 3>}, {transform_indices = @transform_1, window_bounds = array<i64: 1, 1, 3>}, {transform_indices = @transform_2, window_bounds = array<i64: 1, 128, 3>}, {transform_indices = @transform_3, window_bounds = array<i64: 1, 16, 256>}]} {
    %c0_i32 = arith.constant 0 : i32
    %0 = arith.cmpi eq, %arg1, %c0_i32 : i32
    %1 = arith.extui %0 : i1 to i32
    %c0_i32_0 = arith.constant 0 : i32
    %2 = arith.cmpi ne, %1, %c0_i32_0 : i32
    scf.if %2 {
      %cst_39 = arith.constant 0.000000e+00 : f32
      %111 = vector.broadcast %cst_39 : f32 to vector<1x16x256xf32>
      %c0_40 = arith.constant 0 : index
      %c0_41 = arith.constant 0 : index
      %c0_42 = arith.constant 0 : index
      %112 = vector.load %arg5[%c0_40, %c0_41, %c0_42] : memref<1x16x256xf32, #tpu.memory_space<vmem>>, vector<1x16x256xf32>
      tpu.vector_store %arg5[%c0_40, %c0_41, %c0_42], %111 {strides = array<i32>} : memref<1x16x256xf32, #tpu.memory_space<vmem>>, vector<1x16x256xf32>,
    } else {
    }
    %c0 = arith.constant 0 : index
    %c0_1 = arith.constant 0 : index
    %c0_2 = arith.constant 0 : index
    %3 = vector.load %arg2[%c0, %c0_1, %c0_2] : memref<1x1x3xf32, #tpu.memory_space<vmem>>, vector<1x1x3xf32>
    %4 = vector.shape_cast %3 : vector<1x1x3xf32> to vector<1x3xf32>
    %c0_3 = arith.constant 0 : index
    %c0_4 = arith.constant 0 : index
    %c0_5 = arith.constant 0 : index
    %5 = vector.load %arg3[%c0_3, %c0_4, %c0_5] : memref<1x1x3xf32, #tpu.memory_space<vmem>>, vector<1x1x3xf32>
    %6 = vector.shape_cast %5 : vector<1x1x3xf32> to vector<1x3xf32>
    %c128_i32 = arith.constant 128 : i32
    %7 = arith.muli %arg1, %c128_i32 : i32
    %c0_6 = arith.constant 0 : index
    %c0_7 = arith.constant 0 : index
    %c0_8 = arith.constant 0 : index
    %8 = vector.load %arg4[%c0_6, %c0_7, %c0_8] : memref<1x128x3xf32, #tpu.memory_space<vmem>>, vector<1x64x3xf32>
    %9 = vector.shape_cast %8 : vector<1x64x3xf32> to vector<64x3xf32>
    %10 = vector.broadcast %4 : vector<1x3xf32> to vector<64x3xf32>
    %11 = arith.subf %9, %10 : vector<64x3xf32>
    %12 = vector.broadcast %6 : vector<1x3xf32> to vector<64x3xf32>
    %13 = arith.mulf %11, %12 : vector<64x3xf32>
    %cst = arith.constant 2.000000e+00 : f32
    %14 = vector.broadcast %cst : f32 to vector<64x3xf32>
    %15 = arith.mulf %13, %14 : vector<64x3xf32>
    %cst_9 = arith.constant 1.000000e+00 : f32
    %16 = vector.broadcast %cst_9 : f32 to vector<64x3xf32>
    %17 = arith.subf %15, %16 : vector<64x3xf32>
    %cst_10 = arith.constant 1.000000e+00 : f32
    %18 = vector.broadcast %cst_10 : f32 to vector<64x3xf32>
    %19 = arith.addf %17, %18 : vector<64x3xf32>
    %cst_11 = arith.constant 8.000000e+00 : f32
    %20 = vector.broadcast %cst_11 : f32 to vector<64x3xf32>
    %21 = arith.mulf %19, %20 : vector<64x3xf32>
    %22 = math.floor %21 : vector<64x3xf32>
    %cst_12 = arith.constant 0.000000e+00 : f32
    %cst_13 = arith.constant 1.500000e+01 : f32
    %23 = vector.broadcast %cst_12 : f32 to vector<64x3xf32>
    %24 = arith.maximumf %23, %22 : vector<64x3xf32>
    %25 = vector.broadcast %cst_13 : f32 to vector<64x3xf32>
    %26 = arith.minimumf %25, %24 : vector<64x3xf32>
    %27 = arith.fptosi %26 : vector<64x3xf32> to vector<64x3xi32>
    %28 = vector.extract_strided_slice %27 {offsets = [0, 0], sizes = [64, 1], strides = [1, 1]} : vector<64x3xi32> to vector<64x1xi32>
    %29 = vector.extract_strided_slice %27 {offsets = [0, 1], sizes = [64, 1], strides = [1, 1]} : vector<64x3xi32> to vector<64x1xi32>
    %c16_i32 = arith.constant 16 : i32
    %30 = vector.broadcast %c16_i32 : i32 to vector<64x1xi32>
    %31 = arith.muli %29, %30 : vector<64x1xi32>
    %32 = vector.extract_strided_slice %27 {offsets = [0, 2], sizes = [64, 1], strides = [1, 1]} : vector<64x3xi32> to vector<64x1xi32>
    %33 = arith.addi %31, %32 : vector<64x1xi32>
    %34 = tpu.iota {dimensions = array<i32: 0>} : vector<64x1xi32>
    %35 = tpu.iota {dimensions = array<i32: 1>} : vector<64x16xi32>
    %36 = tpu.iota {dimensions = array<i32: 1>} : vector<64x256xi32>
    %c0_i32_14 = arith.constant 0 : i32
    %37 = arith.addi %7, %c0_i32_14 : i32
    %38 = vector.broadcast %37 : i32 to vector<64x1xi32>
    %39 = arith.addi %38, %34 : vector<64x1xi32>
    %c200_i32 = arith.constant 200 : i32
    %40 = vector.broadcast %c200_i32 : i32 to vector<64x1xi32>
    %41 = arith.cmpi slt, %39, %40 : vector<64x1xi32>
    %42 = vector.broadcast %28 : vector<64x1xi32> to vector<64x16xi32>
    %43 = arith.cmpi eq, %35, %42 : vector<64x16xi32>
    %44 = vector.broadcast %41 : vector<64x1xi1> to vector<64x16xi1>
    %45 = arith.andi %43, %44 : vector<64x16xi1>
    %46 = arith.extui %45 : vector<64x16xi1> to vector<64x16xi32>
    %47 = arith.sitofp %46 : vector<64x16xi32> to vector<64x16xf32>
    %48 = arith.truncf %47 : vector<64x16xf32> to vector<64x16xbf16>
    %49 = vector.broadcast %33 : vector<64x1xi32> to vector<64x256xi32>
    %50 = arith.cmpi eq, %36, %49 : vector<64x256xi32>
    %51 = arith.extui %50 : vector<64x256xi1> to vector<64x256xi32>
    %52 = arith.sitofp %51 : vector<64x256xi32> to vector<64x256xf32>
    %53 = arith.truncf %52 : vector<64x256xf32> to vector<64x256xbf16>
    %cst_15 = arith.constant dense<0.000000e+00> : vector<16x256xf32>
    %54 = tpu.matmul %48, %53, %cst_15 {dimension_numbers = #tpu.dot_dimension_numbers<[0], [0], [1], [1], [0, 1, 1, 1], [], []>} : vector<64x16xbf16>, vector<64x256xbf16>, vector<16x256xf32> -> vector<16x256xf32>
    %c0_16 = arith.constant 0 : index
    %c0_17 = arith.constant 0 : index
    %c0_18 = arith.constant 0 : index
    %55 = vector.load %arg5[%c0_16, %c0_17, %c0_18] : memref<1x16x256xf32, #tpu.memory_space<vmem>>, vector<1x16x256xf32>
    %56 = vector.shape_cast %55 : vector<1x16x256xf32> to vector<16x256xf32>
    %57 = arith.addf %56, %54 : vector<16x256xf32>
    %c0_19 = arith.constant 0 : index
    %c0_20 = arith.constant 0 : index
    %c0_21 = arith.constant 0 : index
    %58 = vector.load %arg5[%c0_19, %c0_20, %c0_21] : memref<1x16x256xf32, #tpu.memory_space<vmem>>, vector<1x16x256xf32>
    %59 = vector.shape_cast %58 : vector<1x16x256xf32> to vector<16x256xf32>
    %60 = vector.shape_cast %57 : vector<16x256xf32> to vector<1x16x256xf32>
    tpu.vector_store %arg5[%c0_19, %c0_20, %c0_21], %60 {strides = array<i32>} : memref<1x16x256xf32, #tpu.memory_space<vmem>>, vector<1x16x256xf32>,
    %c0_22 = arith.constant 0 : index
    %c64 = arith.constant 64 : index
    %c0_23 = arith.constant 0 : index
    %61 = vector.load %arg4[%c0_22, %c64, %c0_23] : memref<1x128x3xf32, #tpu.memory_space<vmem>>, vector<1x64x3xf32>
    %62 = vector.shape_cast %61 : vector<1x64x3xf32> to vector<64x3xf32>
    %63 = vector.broadcast %4 : vector<1x3xf32> to vector<64x3xf32>
    %64 = arith.subf %62, %63 : vector<64x3xf32>
    %65 = vector.broadcast %6 : vector<1x3xf32> to vector<64x3xf32>
    %66 = arith.mulf %64, %65 : vector<64x3xf32>
    %cst_24 = arith.constant 2.000000e+00 : f32
    %67 = vector.broadcast %cst_24 : f32 to vector<64x3xf32>
    %68 = arith.mulf %66, %67 : vector<64x3xf32>
    %cst_25 = arith.constant 1.000000e+00 : f32
    %69 = vector.broadcast %cst_25 : f32 to vector<64x3xf32>
    %70 = arith.subf %68, %69 : vector<64x3xf32>
    %cst_26 = arith.constant 1.000000e+00 : f32
    %71 = vector.broadcast %cst_26 : f32 to vector<64x3xf32>
    %72 = arith.addf %70, %71 : vector<64x3xf32>
    %cst_27 = arith.constant 8.000000e+00 : f32
    %73 = vector.broadcast %cst_27 : f32 to vector<64x3xf32>
    %74 = arith.mulf %72, %73 : vector<64x3xf32>
    %75 = math.floor %74 : vector<64x3xf32>
    %cst_28 = arith.constant 0.000000e+00 : f32
    %cst_29 = arith.constant 1.500000e+01 : f32
    %76 = vector.broadcast %cst_28 : f32 to vector<64x3xf32>
    %77 = arith.maximumf %76, %75 : vector<64x3xf32>
    %78 = vector.broadcast %cst_29 : f32 to vector<64x3xf32>
    %79 = arith.minimumf %78, %77 : vector<64x3xf32>
    %80 = arith.fptosi %79 : vector<64x3xf32> to vector<64x3xi32>
    %81 = vector.extract_strided_slice %80 {offsets = [0, 0], sizes = [64, 1], strides = [1, 1]} : vector<64x3xi32> to vector<64x1xi32>
    %82 = vector.extract_strided_slice %80 {offsets = [0, 1], sizes = [64, 1], strides = [1, 1]} : vector<64x3xi32> to vector<64x1xi32>
    %c16_i32_30 = arith.constant 16 : i32
    %83 = vector.broadcast %c16_i32_30 : i32 to vector<64x1xi32>
    %84 = arith.muli %82, %83 : vector<64x1xi32>
    %85 = vector.extract_strided_slice %80 {offsets = [0, 2], sizes = [64, 1], strides = [1, 1]} : vector<64x3xi32> to vector<64x1xi32>
    %86 = arith.addi %84, %85 : vector<64x1xi32>
    %c64_i32 = arith.constant 64 : i32
    %87 = arith.addi %7, %c64_i32 : i32
    %88 = vector.broadcast %87 : i32 to vector<64x1xi32>
    %89 = arith.addi %88, %34 : vector<64x1xi32>
    %c200_i32_31 = arith.constant 200 : i32
    %90 = vector.broadcast %c200_i32_31 : i32 to vector<64x1xi32>
    %91 = arith.cmpi slt, %89, %90 : vector<64x1xi32>
    %92 = vector.broadcast %81 : vector<64x1xi32> to vector<64x16xi32>
    %93 = arith.cmpi eq, %35, %92 : vector<64x16xi32>
    %94 = vector.broadcast %91 : vector<64x1xi1> to vector<64x16xi1>
    %95 = arith.andi %93, %94 : vector<64x16xi1>
    %96 = arith.extui %95 : vector<64x16xi1> to vector<64x16xi32>
    %97 = arith.sitofp %96 : vector<64x16xi32> to vector<64x16xf32>
    %98 = arith.truncf %97 : vector<64x16xf32> to vector<64x16xbf16>
    %99 = vector.broadcast %86 : vector<64x1xi32> to vector<64x256xi32>
    %100 = arith.cmpi eq, %36, %99 : vector<64x256xi32>
    %101 = arith.extui %100 : vector<64x256xi1> to vector<64x256xi32>
    %102 = arith.sitofp %101 : vector<64x256xi32> to vector<64x256xf32>
    %103 = arith.truncf %102 : vector<64x256xf32> to vector<64x256xbf16>
    %cst_32 = arith.constant dense<0.000000e+00> : vector<16x256xf32>
    %104 = tpu.matmul %98, %103, %cst_32 {dimension_numbers = #tpu.dot_dimension_numbers<[0], [0], [1], [1], [0, 1, 1, 1], [], []>} : vector<64x16xbf16>, vector<64x256xbf16>, vector<16x256xf32> -> vector<16x256xf32>
    %c0_33 = arith.constant 0 : index
    %c0_34 = arith.constant 0 : index
    %c0_35 = arith.constant 0 : index
    %105 = vector.load %arg5[%c0_33, %c0_34, %c0_35] : memref<1x16x256xf32, #tpu.memory_space<vmem>>, vector<1x16x256xf32>
    %106 = vector.shape_cast %105 : vector<1x16x256xf32> to vector<16x256xf32>
    %107 = arith.addf %106, %104 : vector<16x256xf32>
    %c0_36 = arith.constant 0 : index
    %c0_37 = arith.constant 0 : index
    %c0_38 = arith.constant 0 : index
    %108 = vector.load %arg5[%c0_36, %c0_37, %c0_38] : memref<1x16x256xf32, #tpu.memory_space<vmem>>, vector<1x16x256xf32>
    %109 = vector.shape_cast %108 : vector<1x16x256xf32> to vector<16x256xf32>
    %110 = vector.shape_cast %107 : vector<16x256xf32> to vector<1x16x256xf32>
    tpu.vector_store %arg5[%c0_36, %c0_37, %c0_38], %110 {strides = array<i32>} : memref<1x16x256xf32, #tpu.memory_space<vmem>>, vector<1x16x256xf32>,
    return
  }
  func.func @transform_0(%arg0: i32, %arg1: i32) -> (i32, i32, i32) {
    %c0_i32 = arith.constant 0 : i32
    %c0_i32_0 = arith.constant 0 : i32
    %c0_i32_1 = arith.constant 0 : i32
    return %arg0, %c0_i32, %c0_i32_0 : i32, i32, i32
  }
  func.func @transform_1(%arg0: i32, %arg1: i32) -> (i32, i32, i32) {
    %c0_i32 = arith.constant 0 : i32
    %c0_i32_0 = arith.constant 0 : i32
    %c0_i32_1 = arith.constant 0 : i32
    return %arg0, %c0_i32, %c0_i32_0 : i32, i32, i32
  }
  func.func @transform_2(%arg0: i32, %arg1: i32) -> (i32, i32, i32) {
    %c0_i32 = arith.constant 0 : i32
    %c0_i32_0 = arith.constant 0 : i32
    return %arg0, %arg1, %c0_i32 : i32, i32, i32
  }
  func.func @transform_3(%arg0: i32, %arg1: i32) -> (i32, i32, i32) {
    %c0_i32 = arith.constant 0 : i32
    %c0_i32_0 = arith.constant 0 : i32
    %c0_i32_1 = arith.constant 0 : i32
    return %arg0, %c0_i32, %c0_i32_0 : i32, i32, i32
  }
}

</mosaic_0001>

<bundles_post_ra>
// kernel: tpu_custom_call.1
= control target key start
LH: loop header
LB: loop body
LE: loop exit
PB: predicated region body
PF: predicated region fallthrough
CT: control target
= control target key end

     0   :  { %8 = vsyncpa [#allocation3], 0  ;;  %s1949_s0 = inlined_call_operand.vmem [shape: f32[2,1,3], index: 0, kind: input, shape index: {}]   ;;  %s1950_s1 = inlined_call_operand.vmem [shape: f32[2,1,3], index: 1, kind: input, shape index: {}]   ;;  %s1951_s2 = inlined_call_operand.vmem [shape: f32[2,200,3], index: 2, kind: input, shape index: {}]   ;;  %s1952_s3 = inlined_call_operand.hbm [shape: f32[2,16,256], index: 3, kind: output, shape index: {}]  }
   0x1   :  { %10 = vsyncpa [#allocation3 + $0x1], 0  ;;  %s1460_s12 = smov 0   ;;  %s1462_s13 = smov 0  }
   0x2   :  { %s1464_s14 = smov 0   ;;  %s1466_s15 = smov 0  }
   0x3   :  { %s1468_s16 = smov 0   ;;  %s1470_s17 = smov 0  }
   0x4   :  { %s1472_s18 = smov 0   ;;  %s1474_s19 = smov 0  }
   0x5 LB: > { %s1094_s20 = sadd.s32 4294967295, %s1430_s19   ;;  %s1095_s21 = sadd.s32 4294967294, %s1430_s19   ;;  %s1430_s19 = sphi %s1474_s19, %s16_s19   ;;  %s1426_s18 = sphi %s1472_s18, %s1973_s18   ;;  %s1422_s17 = sphi %s1470_s17, %s1972_s17   ;;  %s1418_s16 = sphi %s1468_s16, %s1971_s16   ;;  %s1414_s15 = sphi %s1466_s15, %s1970_s15   ;;  %s1410_s14 = sphi %s1464_s14, %s1969_s14   ;;  %s1406_s13 = sphi %s1462_s13, %s1968_s13   ;;  %s1402_s12 = sphi %s1460_s12, %s1967_s12  }
   0x6   : > { %s25_s22 = sadd.s32 1, %s1422_s17  ;;  %s28_s23 = sadd.s32 1, %s1426_s18 }
   0x7   : > { %p26_p0 = scmp.ge.s32.totalorder %s25_s22, 2  ;;  %p125_p1 = scmp.ne.s32.totalorder %s1410_s14, %s1406_s13 }
   0x8   : > { %p126_p2 = scmp.eq.s32.totalorder %s1094_s20, 3  ;;  %p131_p4 = scmp.ne.s32.totalorder %s1406_s13, %s1402_s12 }
   0x9   : > { %s1975_s22 = smov (%p26_p0, %s25_s22), 0  ;;  %s1977_s23 = smov (!%p26_p0, %s28_s23), %s1426_s18 }
   0xa   : > { %1955 = sst [smem:[#allocation5_spill]] %s1975_s22  ;;  %p1509_p3 = por %p126_p2, %p125_p1 }
   0xb   : > { %p30_p5 = scmp.ge.s32.totalorder %s1977_s23, 2  ;;  %p132_p6 = scmp.eq.s32.totalorder %s1095_s21, 3 }
   0xc   : > { %p1098_p7 = scmp.ge.s32.totalorder %s1430_s19, 1  ;;  %p183_p8 = scmp.lt.s32.totalorder %s1430_s19, 5 }
   0xd   : > { %s1979_s23 = smov (%p30_p5, %s1977_s23), 0  ;;  %p1519_p9 = por %p132_p6, %p131_p4 }
   0xe   : > { %1957 = sst [smem:[#allocation6_spill]] %s1979_s23  ;;  %p184_p10 = pnand %p1098_p7, %p183_p8 }
   0xf   : > { %s112_s26 = ssub.s32 %s1426_s18, %s1979_s23  ;;  %s115_s27 = sadd.s32 1, %s1410_s14 }
  0x10   : > { %p113_p11 = scmp.eq.s32.totalorder %s112_s26, 0  ;;  %187 = sbr.rel (%p184_p10) target bundleno = 604 (0x25c), region = 32 }
  0x11   : > { %s1954_s29 = sand.u32 (!%p184_p10), 1, %s1406_s13   ;;  %p221_p12 = scmp.lt.s32.totalorder (!%p184_p10), %s1418_s16, 1 }
  0x12   : > { %s1527_s28 = scalar_select %p113_p11, %s1410_s14, %s115_s27  }
  0x13   : > { %s1099_s30 = sshll.u32 (!%p184_p10), %s1954_s29, 5  ;;  %s1100_s4 = sshll.u32 (!%p184_p10), %s1414_s15, 4 }
  0x14   : > { %p234_p13 = scmp.lt.s32.totalorder (!%p184_p10), %s1100_s4, 24  ;;  %s1546_s29 = scalar_lea.vmem (!%p184_p10), [#allocation2], %s1099_s30 }
  0x15   : > { %s222_s5 = scalar_select %p221_p12, %s1418_s16, 1 }
  0x16   : > { %s1981_s4 = smov (!%p234_p13, %s1100_s4), 24  ;;  %p1102_p0 = scmp.ne.s32.totalorder %s1414_s15, 0 }
  0x17   : > { %s223_s8 = scalar_lea.vmem %s1949_s0, %s222_s5  ;;  %s226_s11 = scalar_lea.vmem %s1950_s1, %s222_s5 }
  0x18   : > { %s1210_s20 = smul.u32 25, %s222_s5 }
  0x19   : > { %249 = sbr.rel (%p1102_p0) target bundleno = 35 (0x23), region = 36 }
  0x1a   : > { %s237_s21 = sadd.s32 %s1210_s20, %s1981_s4 }
  0x1b   : > { %s1101_s26 = sshll.u32 %s237_s21, 3 }
  0x1c   : > { %s1544_s22 = scalar_lea.vmem %s1951_s2, %s1101_s26 }
  0x1e   : > { %v1432_v0 = vmov 0.0  }
  0x1f   : > { %250 = vst [vmem:[%s1546_s29] sm:$0xff] %v1432_v0 }
  0x20   : > { %251 = vst [vmem:[%s1546_s29 + $0x8] sm:$0xff] %v1432_v0 }
  0x21   : > { %252 = vst [vmem:[%s1546_s29 + $0x10] sm:$0xff] %v1432_v0 }
  0x22   : > { %253 = vst [vmem:[%s1546_s29 + $0x18] sm:$0xff] %v1432_v0 }
  0x23 PF: > { %v259_v1 = vld [vmem:[%s1544_s22 + $0x10] sm:$0xff]  ;;  %v1554_v2 = vld [vmem:[%s223_s8] ss:$0 sm:$0xff]  ;;  %v260_v5 = vld [vmem:[%s1544_s22 + $0x18] sm:$0xff]  ;;  %s1433_s23 = smov 127   ;;  %s994_s7 = sshll.u32 %s1546_s29, 4  ;;  %s995_s7 = int_to_ptr.vmem [resolvable:$true] %s994_s7 }
  0x24   : > { %v1556_v3 = vld [vmem:[%s226_s11] ss:$0 sm:$0xff]  ;;  %v258_v6 = vld [vmem:[%s1544_s22 + $0x8] sm:$0xff]  ;;  %v270_v8 = vsub.f32 %v259_v1, %v1554_v2  ;;  %v271_v10 = vsub.f32 %v260_v5, %v1554_v2  ;;  %v264_v12 = vld [vmem:[%s1544_s22 + $0x38] sm:$0xff]  ;;  %s1356_s26 = scalar_lea.hbm %s1952_s3, 64 }
  0x25   : > { %v257_v4 = vld [vmem:[%s1544_s22] sm:$0xff]  ;;  %v269_v11 = vsub.f32 %v258_v6, %v1554_v2  ;;  %v263_v13 = vld [vmem:[%s1544_s22 + $0x30] sm:$0xff]  ;;  %v262_v14 = vld [vmem:[%s1544_s22 + $0x28] sm:$0xff]  ;;  %v275_v16 = vsub.f32 %v264_v12, %v1554_v2 }
  0x26   : > { %v261_v7 = vld [vmem:[%s1544_s22 + $0x20] sm:$0xff]  ;;  %v268_v9 = vsub.f32 %v257_v4, %v1554_v2  ;;  %v274_v17 = vsub.f32 %v263_v13, %v1554_v2  ;;  %v273_v18 = vsub.f32 %v262_v14, %v1554_v2  ;;  %v281_v19 = vmul.f32 %v1556_v3, %v270_v8 }
  0x27   : > { %v272_v15 = vsub.f32 %v261_v7, %v1554_v2  ;;  %v282_v21 = vmul.f32 %v1556_v3, %v271_v10  ;;  %v280_v22 = vmul.f32 %v1556_v3, %v269_v11  ;;  %v286_v24 = vmul.f32 %v1556_v3, %v275_v16  ;;  %v632_v12 = vld [vmem:[%s1544_s22 + $0x60] sm:$0xff] }
  0x28   : > { %v279_v20 = vmul.f32 %v1556_v3, %v268_v9  ;;  %v285_v25 = vmul.f32 %v1556_v3, %v274_v17  ;;  %v284_v26 = vmul.f32 %v1556_v3, %v273_v18  ;;  %v289_v27 = vmul.f32 2.0, %v281_v19 }
  0x29   : > { %v283_v23 = vmul.f32 %v1556_v3, %v272_v15  ;;  %v290_v29 = vmul.f32 2.0, %v282_v21  ;;  %v288_v30 = vmul.f32 2.0, %v280_v22  ;;  %v294_v32 = vmul.f32 2.0, %v286_v24  ;;  %v635_v15 = vld [vmem:[%s1544_s22 + $0x78] sm:$0xff] }
  0x2a   : > { %v287_v28 = vmul.f32 2.0, %v279_v20  ;;  %v293_v33 = vmul.f32 2.0, %v285_v25  ;;  %v292_v34 = vmul.f32 2.0, %v284_v26  ;;  %v1106_v35 = vadd.f32 -1.0, %v289_v27 }
  0x2b   : > { %v291_v31 = vmul.f32 2.0, %v283_v23  ;;  %v1107_v37 = vadd.f32 -1.0, %v290_v29  ;;  %v1105_v38 = vadd.f32 -1.0, %v288_v30  ;;  %v1111_v40 = vadd.f32 -1.0, %v294_v32  ;;  %v634_v30 = vld [vmem:[%s1544_s22 + $0x70] sm:$0xff]  ;;  %v631_v32 = vld [vmem:[%s1544_s22 + $0x58] sm:$0xff] }
  0x2c   : > { %v1104_v36 = vadd.f32 -1.0, %v287_v28  ;;  %v1110_v41 = vadd.f32 -1.0, %v293_v33  ;;  %v1109_v42 = vadd.f32 -1.0, %v292_v34  ;;  %v305_v43 = vadd.f32 1.0, %v1106_v35  ;;  %v630_v34 = vld [vmem:[%s1544_s22 + $0x50] sm:$0xff] }
  0x2d   : > { %v1108_v39 = vadd.f32 -1.0, %v291_v31  ;;  %v306_v45 = vadd.f32 1.0, %v1107_v37  ;;  %v304_v46 = vadd.f32 1.0, %v1105_v38  ;;  %v310_v54 = vadd.f32 1.0, %v1111_v40 }
  0x2e   : > { %v303_v44 = vadd.f32 1.0, %v1104_v36  ;;  %v308_v48 = vadd.f32 1.0, %v1109_v42  ;;  %v313_v49 = vmul.f32 8.0, %v305_v43  ;;  %v309_v55 = vadd.f32 1.0, %v1110_v41 }
  0x2f   : > { %v307_v47 = vadd.f32 1.0, %v1108_v39  ;;  %v314_v51 = vmul.f32 8.0, %v306_v45  ;;  %v312_v52 = vmul.f32 8.0, %v304_v46  ;;  %v318_v4 = vmul.f32 8.0, %v310_v54 }
  0x30   : > { %v311_v50 = vmul.f32 8.0, %v303_v44  ;;  %v316_v56 = vmul.f32 8.0, %v308_v48  ;;  %v321_v57 = vfloor.f32 %v313_v49  ;;  %v317_v5 = vmul.f32 8.0, %v309_v55  ;;  %v633_v48 = vld [vmem:[%s1544_s22 + $0x68] sm:$0xff]  ;;  %v628_v49 = vld [vmem:[%s1544_s22 + $0x40] sm:$0xff] }
  0x31   : > { %v315_v53 = vmul.f32 8.0, %v307_v47  ;;  %v322_v59 = vfloor.f32 %v314_v51  ;;  %v320_v60 = vfloor.f32 %v312_v52  ;;  %v326_v17 = vfloor.f32 %v318_v4  ;;  %v629_v51 = vld [vmem:[%s1544_s22 + $0x48] sm:$0xff]  ;;  %s1103_s22 = sshll.u32 %s1414_s15, 7  ;;  %s1209_s15 = sshll.u32 %s1418_s16, 5 }
  0x32   : > { %v319_v58 = vfloor.f32 %v311_v50  ;;  %v324_v62 = vfloor.f32 %v316_v56  ;;  %v329_v63 = vmax.f32 %v321_v57, 0.0  ;;  %v325_v18 = vfloor.f32 %v317_v5  ;;  %s748_s30 = sadd.s32 64, %s1103_s22  ;;  %s993_s6 = scalar_lea.hbm %s1952_s3, %s1209_s15 }
  0x33   : > { %v323_v61 = vfloor.f32 %v315_v53  ;;  %v330_v8 = vmax.f32 %v322_v59, 0.0  ;;  %v328_v9 = vmax.f32 %v320_v60, 0.0  ;;  %v640_v21 = vsub.f32 %v632_v12, %v1554_v2  ;;  %s996_s8 = sshll.u32 %s993_s6, 4  ;;  %s1964_s16 = sand.u32 1, %s1406_s13   ;;  %s997_s8 = int_to_ptr.hbm [resolvable:$true] %s996_s8 }
  0x34   : > { %v327_v0 = vmax.f32 %v319_v58, 0.0  ;;  %v337_v6 = vmin.f32 %v329_v63, 15.0  ;;  %v332_v11 = vmax.f32 %v324_v62, 0.0  ;;  %v1434_v23 = vmov 0   ;;  %s982_s9 = scalar_lea.sflag [#allocation3], %s1964_s16  ;;  %s1350_s10 = sshra.s32 %s997_s8, 4  ;;  %s1351_s10 = int_to_ptr.hbm [resolvable:$true] %s1350_s10 }
  0x35   : > { %v331_v1 = vmax.f32 %v323_v61, 0.0  ;;  %v338_v19 = vmin.f32 %v330_v8, 15.0  ;;  %v336_v20 = vmin.f32 %v328_v9, 15.0  ;;  %1324 = vset.pattern.permute.xlu1 %v1434_v23  ;;  %v643_v24 = vsub.f32 %v635_v15, %v1554_v2  ;;  %1323 = vset.pattern.permute.xlu0 %v1434_v23  ;;  %s1352_s11 = scalar_lea.hbm %s1351_s10, 32  ;;  %p1357_p5 = scmp.lt.s32.totalorder %s1351_s10, %s1952_s3 }
  0x36   : > { %v335_v7 = vmin.f32 %v327_v0, 15.0  ;;  %v1582_v13 = vcvt.f32.s32 %v337_v6  ;;  %v340_v22 = vmin.f32 %v332_v11, 15.0  ;;  %1322 = vset.pattern.permute.xlu2 %v1434_v23  ;;  %v334_v25 = vmax.f32 %v326_v17, 0.0  ;;  %p1353_p1 = scmp.ne.s32.totalorder %s1351_s10, %s1352_s11  ;;  %p1358_p6 = scmp.lt.s32.totalorder %s1356_s26, %s1352_s11 }
  0x37   : > { %v339_v10 = vmin.f32 %v331_v1, 15.0  ;;  %v1597_v26 = vcvt.f32.s32 %v338_v19  ;;  %v1599_v27 = vcvt.f32.s32 %v336_v20  ;;  %v333_v28 = vmax.f32 %v325_v18, 0.0 }
  0x38   : > { %v1584_v14 = vcvt.f32.s32 %v335_v7  ;;  %363 = vrot.lane.b32.xlu1 %v1582_v13, %s1433_s23  ;;  %v648_v29 = vmul.f32 %v1556_v3, %v640_v21  ;;  %v1603_v31 = vcvt.f32.s32 %v340_v22  ;;  %v651_v33 = vmul.f32 %v1556_v3, %v643_v24  ;;  %p1354_p2 = pnand %p1353_p1, %p1509_p3  ;;  %p1359_p7 = por %p1358_p6, %p1357_p5 }
  0x39   : > { %v1587_v16 = vcvt.f32.s32 %v339_v10  ;;  %v642_v35 = vsub.f32 %v634_v30, %v1554_v2  ;;  %v342_v36 = vmin.f32 %v334_v25, 15.0  ;;  %v341_v37 = vmin.f32 %v333_v28, 15.0 }
  0x3a   : > { %359 = vrot.lane.b32.xlu0 %v1584_v14, %s1433_s23  ;;  %v656_v38 = vmul.f32 2.0, %v648_v29  ;;  %v639_v39 = vsub.f32 %v631_v32, %v1554_v2  ;;  %v659_v40 = vmul.f32 2.0, %v651_v33  ;;  %v638_v41 = vsub.f32 %v630_v34, %v1554_v2  ;;  %p1355_p4 = pneg %p1354_p2 }
  0x3b   : > { %367 = vrot.lane.b32.xlu2 %v1587_v16, %s1433_s23  ;;  %v650_v42 = vmul.f32 %v1556_v3, %v642_v35  ;;  %v1618_v43 = vcvt.f32.s32 %v342_v36  ;;  %v1620_v44 = vcvt.f32.s32 %v341_v37  ;;  %v641_v55 = vsub.f32 %v633_v48, %v1554_v2 }
  0x3c   : > { %v1158_v45 = vadd.f32 -1.0, %v656_v38  ;;  %v647_v46 = vmul.f32 %v1556_v3, %v639_v39  ;;  %v1161_v47 = vadd.f32 -1.0, %v659_v40  ;;  %v646_v50 = vmul.f32 %v1556_v3, %v638_v41  ;;  %p1360_p8 = pnand %p1359_p7, %p1355_p4 }
  0x3d   : > { %v658_v52 = vmul.f32 2.0, %v650_v42  ;;  %v636_v56 = vsub.f32 %v628_v49, %v1554_v2  ;;  %v637_v59 = vsub.f32 %v629_v51, %v1554_v2  ;;  %v649_v63 = vmul.f32 %v1556_v3, %v641_v55 }
  0x3e   : > { %v672_v53 = vadd.f32 1.0, %v1158_v45  ;;  %v655_v54 = vmul.f32 2.0, %v647_v46  ;;  %v675_v57 = vadd.f32 1.0, %v1161_v47  ;;  %v654_v58 = vmul.f32 2.0, %v646_v50 }
  0x3f   : > { %v1160_v60 = vadd.f32 -1.0, %v658_v52  ;;  %v644_v0 = vmul.f32 %v1556_v3, %v636_v56  ;;  %v645_v5 = vmul.f32 %v1556_v3, %v637_v59  ;;  %v657_v9 = vmul.f32 2.0, %v649_v63 }
  0x40   : > { %365 = vrot.lane.b32.xlu1 %v1597_v26, %s1433_s23  ;;  %v680_v61 = vmul.f32 8.0, %v672_v53  ;;  %v1157_v62 = vadd.f32 -1.0, %v655_v54  ;;  %v683_v1 = vmul.f32 8.0, %v675_v57  ;;  %v1156_v4 = vadd.f32 -1.0, %v654_v58 }
  0x41   : > { %v674_v6 = vadd.f32 1.0, %v1160_v60  ;;  %v652_v2 = vmul.f32 2.0, %v644_v0  ;;  %v653_v12 = vmul.f32 2.0, %v645_v5  ;;  %v1159_v19 = vadd.f32 -1.0, %v657_v9 }
  0x42   : > { %361 = vrot.lane.b32.xlu0 %v1599_v27, %s1433_s23  ;;  %v688_v7 = vfloor.f32 %v680_v61  ;;  %v671_v8 = vadd.f32 1.0, %v1157_v62  ;;  %v691_v10 = vfloor.f32 %v683_v1  ;;  %v670_v11 = vadd.f32 1.0, %v1156_v4 }
  0x43   : > { %369 = vrot.lane.b32.xlu2 %v1603_v31, %s1433_s23  ;;  %v682_v15 = vmul.f32 8.0, %v674_v6  ;;  %v1154_v20 = vadd.f32 -1.0, %v652_v2  ;;  %v1155_v22 = vadd.f32 -1.0, %v653_v12  ;;  %v673_v28 = vadd.f32 1.0, %v1159_v19 }
  0x44   : > { %v696_v17 = vmax.f32 %v688_v7, 0.0  ;;  %v679_v18 = vmul.f32 8.0, %v671_v8  ;;  %v699_v3 = vmax.f32 %v691_v10, 0.0  ;;  %v678_v21 = vmul.f32 8.0, %v670_v11 }
  0x45   : > { %v690_v23 = vfloor.f32 %v682_v15  ;;  %v668_v29 = vadd.f32 1.0, %v1154_v20  ;;  %v669_v33 = vadd.f32 1.0, %v1155_v22  ;;  %v681_v37 = vmul.f32 8.0, %v673_v28 }
  0x46   : > { %v704_v24 = vmin.f32 %v696_v17, 15.0  ;;  %v687_v25 = vfloor.f32 %v679_v18  ;;  %v707_v30 = vmin.f32 %v699_v3, 15.0  ;;  %v686_v32 = vfloor.f32 %v678_v21 }
  0x47   : > { %v698_v34 = vmax.f32 %v690_v23, 0.0  ;;  %v676_v38 = vmul.f32 8.0, %v668_v29  ;;  %v677_v41 = vmul.f32 8.0, %v669_v33  ;;  %v689_v46 = vfloor.f32 %v681_v37 }
  0x48   : > { %373 = vrot.lane.b32.xlu1 %v1618_v43, %s1433_s23  ;;  %v1644_v35 = vcvt.f32.s32 %v704_v24  ;;  %v695_v36 = vmax.f32 %v687_v25, 0.0  ;;  %v1646_v39 = vcvt.f32.s32 %v707_v30  ;;  %v694_v40 = vmax.f32 %v686_v32, 0.0 }
  0x49   : > { %v706_v42 = vmin.f32 %v698_v34, 15.0  ;;  %v684_v47 = vfloor.f32 %v676_v38  ;;  %v685_v49 = vfloor.f32 %v677_v41  ;;  %v697_v52 = vmax.f32 %v689_v46, 0.0 }
  0x4a   : > { %371 = vrot.lane.b32.xlu0 %v1620_v44, %s1433_s23  ;;  %v703_v45 = vmin.f32 %v695_v36, 15.0  ;;  %v702_v48 = vmin.f32 %v694_v40, 15.0  ;;  %v1435_v62 = vmov 1   ;;  %v353_v4 = vmul.u32 16, %v1582_v13 }
  0x4b   : > { %413 = vperm.xlu2 %1322, %v1584_v14   ;;  %v1653_v50 = vcvt.f32.s32 %v706_v42  ;;  %v692_v53 = vmax.f32 %v684_v47, 0.0  ;;  %v693_v55 = vmax.f32 %v685_v49, 0.0  ;;  %v705_v56 = vmin.f32 %v697_v52, 15.0 }
  0x4c   : > { %v1655_v51 = vcvt.f32.s32 %v703_v45  ;;  %v1657_v54 = vcvt.f32.s32 %v702_v48  ;;  %v351_v5 = vmul.u32 16, %v1584_v14  ;;  %v383_v10 = vlaneseq }
  0x4d   : > { %v700_v57 = vmin.f32 %v692_v53, 15.0  ;;  %v701_v58 = vmin.f32 %v693_v55, 15.0  ;;  %v1665_v59 = vcvt.f32.s32 %v705_v56  ;;  %v354_v11 = vmul.u32 16, %v1597_v26 }
  0x4e   : > { %v352_v12 = vmul.u32 16, %v1599_v27  ;;  %v1689_v18 = vshrl.u32 %v383_v10, 7  ;;  %v355_v3 = vmul.u32 16, %v1587_v16  ;;  %v1698_v21 = vstv %s1103_s22 }
  0x4f   : > { %v1667_v60 = vcvt.f32.s32 %v700_v57  ;;  %v1669_v61 = vcvt.f32.s32 %v701_v58  ;;  %v1707_v25 = vand.u32 127, %v383_v10  ;;  %v723_v37 = vmul.u32 16, %v1646_v39 }
  0x50   : > { %419 = vperm.xlu1 %1324, %v1582_v13   ;;  %v1693_v20 = vadd.s32 24, %v1689_v18  ;;  %v1705_v23 = vadd.s32 16, %v1689_v18  ;;  %v396_v28 = vadd.s32 %v1698_v21, %v1689_v18  ;;  %v1712_v30 = vadd.s32 8, %v1689_v18 }
  0x51   : > { %v1716_v33 = vadd.s32 40, %v1689_v18  ;;  %v1728_v42 = vadd.s32 32, %v1689_v18  ;;  %v1436_v46 = vmov 0.0   ;;  %v718_v53 = vmul.u32 16, %v1657_v54 }
  0x52   : > { %416 = vperm.xlu0 %1323, %v1599_v27   ;;  %v357_v27 = vmul.u32 16, %v1620_v44  ;;  %v399_v22 = vadd.s32 %v1698_v21, %v1693_v20  ;;  %v398_v36 = vadd.s32 %v1698_v21, %v1705_v23  ;;  %vm404_vm2 = vcmp.lt.s32.totalorder %v396_v28, 200 }
  0x53   : > { %422 = vperm.xlu2 %1322, %v1597_v26   ;;  %v358_v26 = vmul.u32 16, %v1618_v43  ;;  %v401_v38 = vadd.s32 %v1698_v21, %v1716_v33  ;;  %v400_v52 = vadd.s32 %v1698_v21, %v1728_v42 }
  0x54   : > { %vm407_vm0 = vcmp.lt.s32.totalorder %v399_v22, 200  ;;  %vm406_vm6 = vcmp.lt.s32.totalorder %v398_v36, 200  ;;  %v721_v22 = vmul.u32 16, %v1665_v59 }
  0x55   : > { %vm409_vm10 = vcmp.lt.s32.totalorder %v401_v38, 200  ;;  %vm408_vm15 = vcmp.lt.s32.totalorder %v400_v52, 200 }
  0x58   : > { %425 = vperm.xlu1 %1324, %v1587_v16  }
  0x5a   : > { %431 = vperm.xlu0 %1323, %v1620_v44   ;;  %v356_v44 = vmul.u32 16, %v1603_v31 }
  0x5b   : > { %428 = vperm.xlu2 %1322, %v1603_v31   ;;  %v397_v31 = vadd.s32 %v1698_v21, %v1712_v30 }
  0x5d   : > { %vm405_vm7 = vcmp.lt.s32.totalorder %v397_v31, 200 }
  0x60   : > { %434 = vperm.xlu1 %1324, %v1618_v43  }
  0x62   : > { %732 = vrot.lane.b32.xlu0 %v1644_v35, %s1433_s23 }
  0x63   : > { %738 = vrot.lane.b32.xlu2 %v1646_v39, %s1433_s23 }
  0x68   : > { %736 = vrot.lane.b32.xlu1 %v1653_v50, %s1433_s23 }
  0x6a   : > { %730 = vrot.lane.b32.xlu0 %v1655_v51, %s1433_s23 }
  0x6b   : > { %728 = vrot.lane.b32.xlu2 %v1657_v54, %s1433_s23 }
  0x70   : > { %734 = vrot.lane.b32.xlu1 %v1665_v59, %s1433_s23 }
  0x72   : > { %767 = vperm.xlu0 %1323, %v1667_v60  }
  0x73   : > { %726 = vrot.lane.b32.xlu2 %v1669_v61, %s1433_s23 }
  0x78   : > { %724 = vrot.lane.b32.xlu1 %v1667_v60, %s1433_s23 }
  0x7a   : > { %782 = vperm.xlu0 %1323, %v1665_v59  }
  0x7b   : > { %773 = vperm.xlu2 %1322, %v1657_v54  }
  0x80   : > { %770 = vperm.xlu1 %1324, %v1669_v61  }
  0x82   : > { %1326 = vset.pattern.permute.xlu0 %v1435_v62 }
  0x83   : > { %779 = vperm.xlu2 %1322, %v1644_v35  }
  0x88   : > { %776 = vperm.xlu1 %1324, %v1655_v51  }
  0x8b   : > { %788 = vperm.xlu2 %1322, %v1646_v39  }
  0x90   : > { %785 = vperm.xlu1 %1324, %v1653_v50  }
  0x93   : > { %1325 = vset.pattern.permute.xlu2 %v1435_v62 }
  0x95   : > { %v368_v63 = vpop.permute.xlu2 %367 }
  0x96   : > { %v379_v24 = vadd.s32 %v368_v63, %v355_v3 }
  0x98   : > { %1327 = vset.pattern.permute.xlu1 %v1435_v62  ;;  %v1753_v62 = vadd.s32 48, %v1689_v18 }
  0x9d   : > { %v370_v0 = vpop.permute.xlu2 %369 }
  0x9e   : > { %v380_v40 = vadd.s32 %v370_v0, %v356_v44  ;;  %v1756_v0 = vadd.s32 56, %v1689_v18 }
  0xa5   : > { %v414_v1 = vpop.permute.xlu2 %413 }
  0xa6   : > { %vm436_vm3 = vcmp.eq.s32.totalorder %v1707_v25, %v414_v1 }
  0xa7   : > { %vm460_vm5 = vmand %vm436_vm3, %vm404_vm2 }
  0xa8   : > { %v1736_v48 = vsel %vm460_vm5, 1.0, %v1436_v46 }
  0xaa   : > { %v364_v6 = vpop.permute.xlu1 %363 }
  0xab   : > { %v377_v8 = vadd.s32 %v364_v6, %v353_v4 }
  0xac   : > { %v360_v7 = vpop.permute.xlu0 %359 }
  0xad   : > { %v375_v9 = vadd.s32 %v360_v7, %v351_v5  ;;  %v423_v2 = vpop.permute.xlu2 %422  ;;  %495 = vperm.xlu1 %1327, %v377_v8   ;;  %v402_v5 = vadd.s32 %v1698_v21, %v1753_v62  ;;  %v403_v7 = vadd.s32 %v1698_v21, %v1756_v0  ;;  %v717_v8 = vmul.u32 16, %v1669_v61 }
  0xae   : > { %vm439_vm1 = vcmp.eq.s32.totalorder %v1707_v25, %v423_v2  ;;  %v720_v2 = vmul.u32 16, %v1644_v35 }
  0xaf   : > { %489 = vperm.xlu2 %1325, %v375_v9   ;;  %vm463_vm4 = vmand %vm439_vm1, %vm407_vm0  ;;  %vm410_vm2 = vcmp.lt.s32.totalorder %v402_v5, 200 }
  0xb0   : > { %v1731_v47 = vsel %vm463_vm4, 1.0, %v1436_v46  ;;  %vm411_vm4 = vcmp.lt.s32.totalorder %v403_v7, 200  ;;  %v1437_v7 = vmov 1.0|1.0  }
  0xb2   : > { %v366_v15 = vpop.permute.xlu1 %365 }
  0xb3   : > { %v378_v13 = vadd.s32 %v366_v15, %v354_v11 }
  0xb4   : > { %v362_v17 = vpop.permute.xlu0 %361 }
  0xb5   : > { %v376_v14 = vadd.s32 %v362_v17, %v352_v12  ;;  %v429_v19 = vpop.permute.xlu2 %428 }
  0xb6   : > { %vm441_vm12 = vcmp.eq.s32.totalorder %v1707_v25, %v429_v19  ;;  %v719_v19 = vmul.u32 16, %v1655_v51  ;;  %v749_v51 = vstv %s748_s30 }
  0xb7   : > { %492 = vperm.xlu0 %1326, %v376_v14   ;;  %498 = vperm.xlu2 %1325, %v378_v13   ;;  %vm465_vm14 = vmand %vm441_vm12, %vm409_vm10  ;;  %v722_v14 = vmul.u32 16, %v1653_v50  ;;  %v756_v5 = vadd.s32 %v749_v51, %v1753_v62 }
  0xb8   : > { %v1759_v4 = vsel %vm465_vm14, 1.0, %v1436_v46 }
  0xba   : > { %v374_v16 = vpop.permute.xlu1 %373 }
  0xbb   : > { %v382_v43 = vadd.s32 %v374_v16, %v358_v26  ;;  %v716_v16 = vmul.u32 16, %v1667_v60 }
  0xbc   : > { %v372_v29 = vpop.permute.xlu0 %371 }
  0xbd   : > { %v381_v32 = vadd.s32 %v372_v29, %v357_v27  ;;  %v739_v34 = vpop.permute.xlu2 %738  ;;  %510 = vperm.xlu1 %1327, %v382_v43  }
  0xbe   : > { %v747_v41 = vadd.s32 %v739_v34, %v723_v37  ;;  %v750_v34 = vadd.s32 %v749_v51, %v1689_v18  ;;  %v753_v18 = vadd.s32 %v749_v51, %v1693_v20 }
  0xbf   : > { %507 = vperm.xlu0 %1326, %v381_v32   ;;  %501 = vperm.xlu2 %1325, %v379_v24   ;;  %v751_v32 = vadd.s32 %v749_v51, %v1712_v30 }
  0xc0   : > { %vm758_vm10 = vcmp.lt.s32.totalorder %v750_v34, 200  ;;  %vm761_vm14 = vcmp.lt.s32.totalorder %v753_v18, 200 }
  0xc2   : > { %v420_v45 = vpop.permute.xlu1 %419 }
  0xc3   : > { %vm438_vm8 = vcmp.eq.s32.totalorder %v1707_v25, %v420_v45 }
  0xc4   : > { %v417_v39 = vpop.permute.xlu0 %416  ;;  %vm462_vm11 = vmand %vm438_vm8, %vm406_vm6  ;;  %vm759_vm8 = vcmp.lt.s32.totalorder %v751_v32, 200 }
  0xc5   : > { %vm437_vm9 = vcmp.eq.s32.totalorder %v1707_v25, %v417_v39  ;;  %v1740_v49 = vsel %vm462_vm11, 1.0, %v1436_v46  ;;  %504 = vperm.xlu1 %1327, %v380_v40   ;;  %v729_v57 = vpop.permute.xlu2 %728  ;;  %v752_v40 = vadd.s32 %v749_v51, %v1705_v23  ;;  %v755_v23 = vadd.s32 %v749_v51, %v1716_v33 }
  0xc6   : > { %vm461_vm13 = vmand %vm437_vm9, %vm405_vm7  ;;  %v485_v55 = vpack.c.bf16 %v1731_v47, %v1740_v49  ;;  %v742_v63 = vadd.s32 %v729_v57, %v718_v53  ;;  %v754_v53 = vadd.s32 %v749_v51, %v1728_v42 }
  0xc7   : > { %864 = vperm.xlu0 %1326, %v747_v41   ;;  %v1748_v56 = vsel %vm461_vm13, 1.0, %v1436_v46 }
  0xc8   : > { %v484_v58 = vpack.c.bf16 %v1748_v56, %v1736_v48 }
  0xca   : > { %v426_v54 = vpop.permute.xlu1 %425 }
  0xcb   : > { %vm440_vm0 = vcmp.eq.s32.totalorder %v1707_v25, %v426_v54 }
  0xcc   : > { %v432_v1 = vpop.permute.xlu0 %431  ;;  %vm464_vm1 = vmand %vm440_vm0, %vm408_vm15  ;;  %vm760_vm0 = vcmp.lt.s32.totalorder %v752_v40, 200 }
  0xcd   : > { %v1765_v6 = vsel %vm464_vm1, 1.0, %v1436_v46  ;;  %vm442_vm3 = vcmp.eq.s32.totalorder %v1707_v25, %v432_v1  ;;  %v727_v10 = vpop.permute.xlu2 %726 }
  0xce   : > { %v486_v9 = vpack.c.bf16 %v1759_v4, %v1765_v6  ;;  %v741_v11 = vadd.s32 %v727_v10, %v717_v8  ;;  %vm466_vm5 = vmand %vm442_vm3, %vm410_vm2 }
  0xcf   : > { %849 = vperm.xlu0 %1326, %v742_v63   ;;  %v1776_v61 = vsel %vm466_vm5, 1.0, %v1436_v46  ;;  %v1818_v63 = vadd.s32 128, %v1707_v25 }
  0xd2   : > { %v435_v12 = vpop.permute.xlu1 %434 }
  0xd3   : > { %vm443_vm6 = vcmp.eq.s32.totalorder %v1707_v25, %v435_v12 }
  0xd4   : > { %v733_v15 = vpop.permute.xlu0 %732  ;;  %vm467_vm7 = vmand %vm443_vm6, %vm411_vm4  ;;  %vm762_vm4 = vcmp.lt.s32.totalorder %v754_v53, 200  ;;  %vm763_vm6 = vcmp.lt.s32.totalorder %v755_v23, 200 }
  0xd5   : > { %v744_v17 = vadd.s32 %v733_v15, %v720_v2  ;;  %v1779_v13 = vsel %vm467_vm7, 1.0, %v1436_v46  ;;  %v774_v50 = vpop.permute.xlu2 %773 }
  0xd6   : > { %v487_v35 = vpack.c.bf16 %v1779_v13, %v1776_v61  ;;  %vm792_vm1 = vcmp.eq.s32.totalorder %v1707_v25, %v774_v50  ;;  %v619_v50 = vld [vmem:[%s1546_s29 + $0x18] sm:$0xff] }
  0xd7   : > { %855 = vperm.xlu1 %1327, %v744_v17   ;;  %846 = vperm.xlu0 %1326, %v741_v11   ;;  %vm816_vm3 = vmand %vm792_vm1, %vm760_vm0 }
  0xd8   : > { %v1164_v39 = vsel %vm816_vm3, 1.0, %v1436_v46 }
  0xda   : > { %v737_v3 = vpop.permute.xlu1 %736 }
  0xdb   : > { %v746_v26 = vadd.s32 %v737_v3, %v722_v14  ;;  %v617_v3 = vld [vmem:[%s1546_s29 + $0x8] sm:$0xff] }
  0xdc   : > { %v731_v21 = vpop.permute.xlu0 %730 }
  0xdd   : > { %v743_v27 = vadd.s32 %v731_v21, %v719_v19  ;;  %861 = vperm.xlu2 %1325, %v746_v26   ;;  %v780_v59 = vpop.permute.xlu2 %779  ;;  %v616_v19 = vld [vmem:[%s1546_s29] sm:$0xff] }
  0xde   : > { %vm794_vm5 = vcmp.eq.s32.totalorder %v1707_v25, %v780_v59 }
  0xdf   : > { %852 = vperm.xlu1 %1327, %v743_v27  }
  0xe2   : > { %v735_v24 = vpop.permute.xlu1 %734 }
  0xe3   : > { %v745_v28 = vadd.s32 %v735_v24, %v721_v22 }
  0xe4   : > { %v768_v36 = vpop.permute.xlu0 %767 }
  0xe5   : > { %858 = vperm.xlu2 %1325, %v745_v28   ;;  %vm790_vm11 = vcmp.eq.s32.totalorder %v1707_v25, %v768_v36  ;;  %v789_v30 = vpop.permute.xlu2 %788 }
  0xe6   : > { %vm814_vm13 = vmand %vm790_vm11, %vm758_vm10  ;;  %vm797_vm1 = vcmp.eq.s32.totalorder %v1707_v25, %v789_v30 }
  0xe7   : > { %v1162_v37 = vsel %vm814_vm13, 1.0, %v1436_v46 }
  0xea   : > { %v725_v29 = vpop.permute.xlu1 %724 }
  0xeb   : > { %v740_v43 = vadd.s32 %v725_v29, %v716_v16  ;;  %v618_v29 = vld [vmem:[%s1546_s29 + $0x10] sm:$0xff] }
  0xec   : > { %v783_v48 = vpop.permute.xlu0 %782 }
  0xed   : > { %843 = vperm.xlu2 %1325, %v740_v43   ;;  %vm795_vm7 = vcmp.eq.s32.totalorder %v1707_v25, %v783_v48 }
  0xf2   : > { %v771_v44 = vpop.permute.xlu1 %770 }
  0xf3   : > { %vm791_vm9 = vcmp.eq.s32.totalorder %v1707_v25, %v771_v44 }
  0xf4   : > { %vm815_vm12 = vmand %vm791_vm9, %vm759_vm8 }
  0xf5   : > { %v1163_v60 = vsel %vm815_vm12, 1.0, %v1436_v46  ;;  %vm818_vm8 = vmand %vm794_vm5, %vm762_vm4 }
  0xf6   : > { %v838_v31 = vpack.c.bf16 %v1163_v60, %v1162_v37  ;;  %vm819_vm9 = vmand %vm795_vm7, %vm763_vm6  ;;  %v1166_v42 = vsel %vm818_vm8, 1.0, %v1436_v46 }
  0xf7   : > { %v1167_v33 = vsel %vm819_vm9, 1.0, %v1436_v46 }
  0xf8   : > { %v840_v49 = vpack.c.bf16 %v1167_v33, %v1166_v42 }
  0xfa   : > { %v777_v38 = vpop.permute.xlu1 %776 }
  0xfb   : > { %vm793_vm15 = vcmp.eq.s32.totalorder %v1707_v25, %v777_v38 }
  0xfc   : > { %vm817_vm2 = vmand %vm793_vm15, %vm761_vm14 }
  0xfd   : > { %v1165_v45 = vsel %vm817_vm2, 1.0, %v1436_v46  ;;  %vm764_vm2 = vcmp.lt.s32.totalorder %v756_v5, 200 }
  0xfe   : > { %v839_v52 = vpack.c.bf16 %v1165_v45, %v1164_v39 }
 0x102   : > { %v786_v20 = vpop.permute.xlu1 %785 }
 0x103   : > { %vm796_vm3 = vcmp.eq.s32.totalorder %v1707_v25, %v786_v20 }
 0x104   : > { %vm1837_vm5 = vmand %vm796_vm3, %vm764_vm2 }
 0x109   : > { %v1802_v41 = vpop.permute.xlu2 %489 }
 0x111   : > { %v499_v56 = vpop.permute.xlu2 %498 }
 0x112   : > { %vm518_vm3 = vcmp.eq.s32.totalorder %v1707_v25, %v499_v56 }
 0x114   : > { %1328 = vxpose.binary.xlu1.c.b16.start [1/8] (short) (narrow) %v838_v31, %v484_v58, 16 }
 0x119   : > { %v502_v47 = vpop.permute.xlu2 %501 }
 0x11a   : > { %vm520_vm6 = vcmp.eq.s32.totalorder %v1707_v25, %v502_v47 }
 0x11f   : > { %v496_v57 = vpop.permute.xlu1 %495 }
 0x124   : > { %1329 = vxpose.binary.xlu1.c.b16.cont [2/8] (short) (narrow) %v839_v52, %v485_v55, 16  ;;  %v757_v55 = vadd.s32 %v749_v51, %v1756_v0  ;;  %v1959_v0 = vmov 0 }
 0x126   : > { %vm765_vm0 = vcmp.lt.s32.totalorder %v757_v55, 200 }
 0x127   : > { %vm1833_vm4 = vmand %vm797_vm1, %vm765_vm0  ;;  %vm517_vm1 = vcmp.eq.s32.totalorder %v1818_v63, %v496_v57 }
 0x128   : > { %v1960_v0 = vsel %vm1833_vm4, 4294967295, %v1959_v0 }
 0x129   : > { %v1813_v58 = vpop.permute.xlu0 %492 }
 0x12f   : > { %v511_v54 = vpop.permute.xlu1 %510 }
 0x130   : > { %vm526_vm11 = vcmp.eq.s32.totalorder %v1707_v25, %v511_v54  ;;  %vm527_vm13 = vcmp.eq.s32.totalorder %v1818_v63, %v511_v54 }
 0x131   : > { %v508_v1 = vpop.permute.xlu0 %507 }
 0x132   : > { %vm524_vm10 = vcmp.eq.s32.totalorder %v1707_v25, %v508_v1  ;;  %vm525_vm12 = vcmp.eq.s32.totalorder %v1818_v63, %v508_v1 }
 0x133   : > { %vm1136_vm14 = vmpackc.low %vm526_vm11, %vm524_vm10  ;;  %vm521_vm10 = vcmp.eq.s32.totalorder %v1818_v63, %v502_v47 }
 0x134   : > { %1330 = vxpose.binary.xlu1.c.b16.cont [3/8] (short) (narrow) %v840_v49, %v486_v9, 16  ;;  %vm1145_vm15 = vmpackc.low %vm527_vm13, %vm525_vm12  ;;  %v1168_v9 = vsel %vm1837_vm5, 1.0, %v1436_v46  ;;  %vm512_vm5 = vcmp.eq.s32.totalorder %v1707_v25, %v1802_v41 }
 0x135   : > { %1137 = vmatpush.bf16.msk.msra.mxu0 %vm1136_vm14, %v1437_v7  ;;  %1146 = vmatpush.bf16.msk.msra.mxu1 %vm1145_vm15, %v1437_v7  ;;  %vm516_vm15 = vcmp.eq.s32.totalorder %v1707_v25, %v496_v57 }
 0x136   : > { %vm1140_vm4 = vmpackc.low %vm518_vm3, %vm516_vm15 }
 0x137   : > { %v505_v62 = vpop.permute.xlu1 %504  ;;  %v862_v8 = vpop.permute.xlu2 %861 }
 0x138   : > { %vm522_vm7 = vcmp.eq.s32.totalorder %v1707_v25, %v505_v62  ;;  %vm523_vm8 = vcmp.eq.s32.totalorder %v1818_v63, %v505_v62  ;;  %vm878_vm9 = vcmp.eq.s32.totalorder %v1707_v25, %v862_v8  ;;  %vm879_vm13 = vcmp.eq.s32.totalorder %v1818_v63, %v862_v8 }
 0x139   : > { %v865_v6 = vpop.permute.xlu0 %864  ;;  %vm1138_vm11 = vmpackc.low %vm522_vm7, %vm520_vm6  ;;  %vm519_vm7 = vcmp.eq.s32.totalorder %v1818_v63, %v499_v56 }
 0x13a   : > { %vm880_vm12 = vcmp.eq.s32.totalorder %v1707_v25, %v865_v6  ;;  %vm881_vm14 = vcmp.eq.s32.totalorder %v1818_v63, %v865_v6  ;;  %1139 = vmatpush.bf16.msk.msra.mxu0 %vm1138_vm11, %v1437_v7  ;;  %vm1147_vm0 = vmpackc.low %vm523_vm8, %vm521_vm10  ;;  %vm514_vm8 = vcmp.eq.s32.totalorder %v1707_v25, %v1813_v58  ;;  %vm1963_vm10 = vnez %v1960_v0 }
 0x13b   : > { %1148 = vmatpush.bf16.msk.msra.mxu1 %vm1147_vm0, %v1437_v7  ;;  %vm1186_vm2 = vmpackc.low %vm880_vm12, %vm878_vm9  ;;  %v1169_v2 = vsel %vm1963_vm10, 1.0, %v1436_v46  ;;  %vm515_vm11 = vcmp.eq.s32.totalorder %v1818_v63, %v1813_v58  ;;  %vm513_vm12 = vcmp.eq.s32.totalorder %v1818_v63, %v1802_v41 }
 0x13c   : > { %1187 = vmatpush.bf16.msk.msra.mxu2 %vm1186_vm2, %v1437_v7  ;;  %vm1195_vm6 = vmpackc.low %vm881_vm14, %vm879_vm13  ;;  %v841_v10 = vpack.c.bf16 %v1169_v2, %v1168_v9 }
 0x13d   : > { %1196 = vmatpush.bf16.msk.msra.mxu3 %vm1195_vm6, %v1437_v7  ;;  %vm1149_vm9 = vmpackc.low %vm519_vm7, %vm517_vm1 }
 0x13e   : > { %1141 = vmatpush.bf16.msk.msra.mxu0 %vm1140_vm4, %v1437_v7  ;;  %vm1142_vm13 = vmpackc.low %vm514_vm8, %vm512_vm5 }
 0x13f   : > { %1150 = vmatpush.bf16.msk.msra.mxu1 %vm1149_vm9, %v1437_v7  ;;  %vm1151_vm4 = vmpackc.low %vm515_vm11, %vm513_vm12  ;;  %v859_v46 = vpop.permute.xlu2 %858 }
 0x140   : > { %vm876_vm14 = vcmp.eq.s32.totalorder %v1707_v25, %v859_v46  ;;  %vm877_vm15 = vcmp.eq.s32.totalorder %v1818_v63, %v859_v46 }
 0x141   : > { %v850_v11 = vpop.permute.xlu0 %849 }
 0x142   : > { %1143 = vmatpush.bf16.msk.msra.mxu0 %vm1142_vm13, %v1437_v7  ;;  %vm870_vm6 = vcmp.eq.s32.totalorder %v1707_v25, %v850_v11  ;;  %vm871_vm7 = vcmp.eq.s32.totalorder %v1818_v63, %v850_v11 }
 0x143   : > { %1152 = vmatpush.bf16.msk.msra.mxu1 %vm1151_vm4, %v1437_v7 }
 0x144   : > { %1331 = vxpose.binary.xlu1.c.b16.end [4/8] (short) (narrow) %v841_v10, %v487_v35, 16 }
 0x147   : > { %v844_v17 = vpop.permute.xlu2 %843 }
 0x148   : > { %vm866_vm11 = vcmp.eq.s32.totalorder %v1707_v25, %v844_v17  ;;  %vm867_vm13 = vcmp.eq.s32.totalorder %v1818_v63, %v844_v17 }
 0x149   : > { %v856_v12 = vpop.permute.xlu1 %855  ;;  %v847_v15 = vpop.permute.xlu0 %846 }
 0x14a   : > { %vm874_vm0 = vcmp.eq.s32.totalorder %v1707_v25, %v856_v12  ;;  %vm875_vm1 = vcmp.eq.s32.totalorder %v1818_v63, %v856_v12  ;;  %vm868_vm10 = vcmp.eq.s32.totalorder %v1707_v25, %v847_v15  ;;  %vm869_vm12 = vcmp.eq.s32.totalorder %v1818_v63, %v847_v15 }
 0x14b   : > { %vm1188_vm2 = vmpackc.low %vm876_vm14, %vm874_vm0  ;;  %vm584_vm0 = vcmask 523264  }
 0x14c   : > { %1189 = vmatpush.bf16.msk.msra.mxu2 %vm1188_vm2, %v1437_v7  ;;  %vm1197_vm3 = vmpackc.low %vm877_vm15, %vm875_vm1 }
 0x14d   : > { %1198 = vmatpush.bf16.msk.msra.mxu3 %vm1197_vm3, %v1437_v7  ;;  %vm1192_vm14 = vmpackc.low %vm868_vm10, %vm866_vm11 }
 0x14e   : > { %vm1201_vm15 = vmpackc.low %vm869_vm12, %vm867_vm13 }
 0x151   : > { %v853_v61 = vpop.permute.xlu1 %852 }
 0x152   : > { %vm872_vm8 = vcmp.eq.s32.totalorder %v1707_v25, %v853_v61  ;;  %vm873_vm9 = vcmp.eq.s32.totalorder %v1818_v63, %v853_v61 }
 0x153   : > { %vm1190_vm5 = vmpackc.low %vm872_vm8, %vm870_vm6 }
 0x154   : > { %1191 = vmatpush.bf16.msk.msra.mxu2 %vm1190_vm5, %v1437_v7  ;;  %vm1199_vm4 = vmpackc.low %vm873_vm9, %vm871_vm7 }
 0x155   : > { %1200 = vmatpush.bf16.msk.msra.mxu3 %vm1199_vm4, %v1437_v7 }
 0x158   : > { %1193 = vmatpush.bf16.msk.msra.mxu2 %vm1192_vm14, %v1437_v7 }
 0x159   : > { %1202 = vmatpush.bf16.msk.msra.mxu3 %vm1201_vm15, %v1437_v7 }
 0x1c0   : > { %v1332_v25 = vpop.trf.xlu1 }
 0x1c1   : > { %1144 = vmatmul.msk.bf16.vlgmr.msra.gmra.mxu0 %vm584_vm0, %v1332_v25  ;;  %1153 = vmatmul.msk.bf16.vlgmr.msra.gmra.mxu1 %vm584_vm0, %v1332_v25 }
 0x1c8   : > { %v1333_v13 = vpop.trf.xlu1 }
 0x1c9   : > { %1194 = vmatmul.msk.bf16.vlgmr.msra.gmra.mxu2 %vm584_vm0, %v1333_v13  ;;  %1203 = vmatmul.msk.bf16.vlgmr.msra.gmra.mxu3 %vm584_vm0, %v1333_v13 }
 0x23e   : > { %v597_v35 = vpop.f32.mrf.mxu0  ;;  %v611_v14 = vpop.f32.mrf.mxu1 }
 0x23f   : > { %v620_v21 = vadd.f32 %v616_v19, %v597_v35  ;;  %v621_v26 = vadd.f32 %v617_v3, %v611_v14 }
 0x246   : > { %v599_v16 = vpop.f32.mrf.mxu0  ;;  %v613_v43 = vpop.f32.mrf.mxu1 }
 0x247   : > { %v622_v51 = vadd.f32 %v618_v29, %v599_v16  ;;  %v623_v32 = vadd.f32 %v619_v50, %v613_v43 }
 0x24c   : > { %v950_v27 = vpop.f32.mrf.mxu2  ;;  %v964_v22 = vpop.f32.mrf.mxu3 }
 0x24d   : > { %v973_v24 = vadd.f32 %v950_v27, %v620_v21  ;;  %v974_v28 = vadd.f32 %v964_v22, %v621_v26 }
 0x24f   : > { %977 = vst [vmem:[%s1546_s29] sm:$0xff] %v973_v24 }
 0x250   : > { %978 = vst [vmem:[%s1546_s29 + $0x8] sm:$0xff] %v974_v28 }
 0x254   : > { %v952_v44 = vpop.f32.mrf.mxu2  ;;  %v966_v34 = vpop.f32.mrf.mxu3 }
 0x255   : > { %v975_v36 = vadd.f32 %v952_v44, %v622_v51  ;;  %v976_v59 = vadd.f32 %v966_v34, %v623_v32 }
 0x257   : > { %979 = vst [vmem:[%s1546_s29 + $0x10] sm:$0xff] %v975_v36 }
 0x258   : > { %980 = vst [vmem:[%s1546_s29 + $0x18] sm:$0xff] %v976_v59 }
 0x259   : > { %1363 = shalt.err (!%p1360_p8)
}
 0x25a   : > { %s1438_s29 = smov 256   ;;  %s1439_s22 = smov 16  }
 0x25b   : > { %1243 = dma.vmem_to_hbm [thread:$0]  (%p1509_p3), %s995_s7, 512, %s997_s8, %s982_s9, %s1438_s29, %s1438_s29, %s1439_s22  }
 0x25c PF: > { %p1249_p10 = scmp.ge.s32.totalorder %s1430_s19, 2  ;;  %s1011_s30 = sand.u32 1, %s1402_s12  }
 0x25d   : > { %s1012_s15 = scalar_lea.sflag [#allocation3], %s1011_s30 }
 0x25e   : > { %p1246_p11 = pnand %p1249_p10, %p1519_p9 }
 0x260   : > { %p1247_p12 = pneg %p1246_p11 }
 0x262   : > { %1397 = dma.done.wait (%p1247_p12), %s1012_s15, 512  }
 0x263   : > { %1399 = vsyncadd (%p1247_p12), %s1012_s15, 4294966784  ;;  %s16_s19 = sadd.s32 1, %s1430_s19   ;;  %s1965_s24 = sld [smem:[#allocation5_spill]] }
 0x264   : > { %p13_p13 = scmp.ge.s32.totalorder %s16_s19, 6   ;;  %s1966_s4 = sld [smem:[#allocation6_spill]] }
 0x265   : > { %s1967_s12 = smov %s1406_s13  ;;  %s1968_s13 = smov %s1410_s14 }
 0x266   : > { %s1969_s14 = smov %s1527_s28  ;;  %s1970_s15 = smov %s1422_s17 }
 0x267   : > { %s1971_s16 = smov %s1426_s18  ;;  %15 = sbr.rel (!%p13_p13) target bundleno = 5 (0x5), region = 77 }
 0x269   : > { %s1972_s17 = smov %s1965_s24 }
 0x26a   : > { %s1973_s18 = smov %s1966_s4 }
 0x26c   :  { %1018 = vsyncpa [#allocation3], 1 }
 0x26d   :  { %1020 = vsyncpa [#allocation3 + $0x1], 1 }

</bundles_post_ra>
